<compile_context>
chip_gen: v7x
topology: tpu7x:2x2x1
jax: 0.10.0
libtpu: 0.0.40
codegen_flags: <defaults>
</compile_context>

<pallas_src>
import jax
import jax.numpy as jnp
from jax.experimental import pallas as pl
from jax.experimental.pallas import tpu as pltpu


def _make_batch2wide_3d_kernel(tb, o0, o1, s1, s2):
    """Builds a kernel assembling tb wide tiles from tb*o0*o1 input tiles."""

    def kernel(x_ref, y_ref):
        # x_ref: (tb*o0*o1, s1, s2)   consecutive small input tiles
        # y_ref: (tb, o0*s1, o1*s2)   assembled wide tiles (lane-dense K1)
        for t in range(tb):                       # static, fully unrolled
            base = t * o0 * o1
            for i in range(o0):
                for j in range(o1):
                    y_ref[t, pl.ds(i * s1, s1), pl.ds(j * s2, s2)] = (
                        x_ref[base + i * o1 + j, :, :]
                    )

    return kernel


def batch2wide_3d(x, kernal_size, *, samples_per_step=None):
    """Pallas implementation of Batch2wide._forward3d.

    Args:
      x: [B, s1, s2] array, with B divisible by (K0//s1)*(K1//s2).
      kernal_size: (K0, K1), K0 % s1 == 0 and K1 % s2 == 0.

    Returns:
      [B // (o0*o1), K0, K1] array, identical to the PyTorch
      view / permute(0,1,3,2,4) / contiguous / view sequence.
    """
    B, s1, s2 = x.shape
    K0, K1 = kernal_size
    o0 = K0 // s1
    o1 = K1 // s2
    if o0 * s1 != K0 or o1 * s2 != K1:
        raise ValueError("kernal_size must be a multiple of the tile shape")
    tiles_per_out = o0 * o1
    if B % tiles_per_out != 0:
        raise ValueError("batch must be divisible by (K0//s1)*(K1//s2)")
    n_out = B // tiles_per_out

    if samples_per_step is None:
        # ~2 MiB of output per grid step (good pipelining, small VMEM
        # footprint on every generation), but cap the unrolled store count
        # (tb * o0 * o1) so the kernel body stays small.
        bytes_per_sample = K0 * K1 * x.dtype.itemsize
        tb = max(1, (2 * 1024 * 1024) // max(1, bytes_per_sample))
        tb = min(tb, n_out, max(1, 128 // tiles_per_out))
        while n_out % tb:
            tb -= 1
    else:
        tb = samples_per_step
        if n_out % tb:
            raise ValueError("samples_per_step must divide the output batch")

    grid = (n_out // tb,)
    kernel = _make_batch2wide_3d_kernel(tb, o0, o1, s1, s2)
    nbytes = x.size * x.dtype.itemsize

    return pl.pallas_call(
        kernel,
        out_shape=jax.ShapeDtypeStruct((n_out, K0, K1), x.dtype),
        grid_spec=pltpu.PrefetchScalarGridSpec(
            num_scalar_prefetch=0,
            grid=grid,
            in_specs=[
                pl.BlockSpec((tb * tiles_per_out, s1, s2), lambda n: (n, 0, 0))
            ],
            out_specs=pl.BlockSpec((tb, K0, K1), lambda n: (n, 0, 0)),
        ),
        compiler_params=pltpu.CompilerParams(
            dimension_semantics=("parallel",),
        ),
        cost_estimate=pl.CostEstimate(
            flops=0, transcendentals=0, bytes_accessed=2 * nbytes
        ),
    )(x)


def batch2wide_2d(x, kernal_size):
    """Batch2wide._forward2d: x.view(-1, kernalSize).

    A row-major view is a zero-cost metadata reshape; a copy kernel would add
    2 * size bytes of HBM traffic for nothing, so no pallas_call here.
    """
    return x.reshape(-1, kernal_size)


class Batch2Wide:
    """JAX/Pallas port of the PyTorch Batch2wide module."""

    def __init__(self, dims):
        if dims == 1:
            self._fn = batch2wide_2d
        elif dims == 2:
            self._fn = batch2wide_3d
        else:
            raise NotImplementedError("Filter size not implemented")

    def __call__(self, x, kernal_size):
        return self._fn(x, kernal_size)


if __name__ == "__main__":
    key = jax.random.PRNGKey(0)

    # ---- dims == 2 (_forward3d): batch of 16x16 tiles -> 32x32 wide tiles ----
    B, s1, s2 = 8, 16, 16
    K0, K1 = 32, 32
    x3 = jax.random.normal(key, (B, s1, s2), dtype=jnp.float32)

    layer3d = Batch2Wide(dims=2)
    y3 = jax.block_until_ready(layer3d(x3, (K0, K1)))

    o0, o1 = K0 // s1, K1 // s2
    n_out = B // (o0 * o1)
    ref3 = (
        x3.reshape(n_out, o0, o1, s1, s2)
        .transpose(0, 1, 3, 2, 4)
        .reshape(n_out, K0, K1)
    )
    assert y3.shape == (n_out, K0, K1) and y3.dtype == x3.dtype
    assert bool(jnp.all(y3 == ref3))

    # ---- dims == 1 (_forward2d): pure row-major reshape ----
    x2 = jax.random.normal(jax.random.PRNGKey(1), (2, 4, 16, 16),
                           dtype=jnp.float32)
    layer2d = Batch2Wide(dims=1)
    y2 = jax.block_until_ready(layer2d(x2, 32))
    assert y2.shape == (x2.size // 32, 32)
    assert bool(jnp.all(y2 == x2.reshape(-1, 32)))

    print("KERNEL_OK")
</pallas_src>

<mosaic_0001>
module attributes {stable_mosaic.version = 11 : i64} {
  func.func @kernel(%arg0: i32, %arg1: memref<8x16x16xf32, #tpu.memory_space<vmem>>, %arg2: memref<2x32x32xf32, #tpu.memory_space<vmem>>) attributes {dimension_semantics = [#tpu.dimension_semantics<parallel>], iteration_bounds = array<i64: 1>, scalar_prefetch = 0 : i64, scratch_operands = 0 : i64, tpu.core_type = #tpu.core_type<tc>, window_params = [{transform_indices = @transform_0, window_bounds = array<i64: 8, 16, 16>}, {transform_indices = @transform_1, window_bounds = array<i64: 2, 32, 32>}]} {
    %c0 = arith.constant 0 : index
    %c0_0 = arith.constant 0 : index
    %c0_1 = arith.constant 0 : index
    %0 = vector.load %arg1[%c0, %c0_0, %c0_1] : memref<8x16x16xf32, #tpu.memory_space<vmem>>, vector<1x16x16xf32>
    %1 = vector.shape_cast %0 : vector<1x16x16xf32> to vector<16x16xf32>
    %c0_2 = arith.constant 0 : index
    %c0_3 = arith.constant 0 : index
    %c0_4 = arith.constant 0 : index
    %2 = vector.load %arg2[%c0_2, %c0_3, %c0_4] : memref<2x32x32xf32, #tpu.memory_space<vmem>>, vector<1x16x16xf32>
    %3 = vector.shape_cast %2 : vector<1x16x16xf32> to vector<16x16xf32>
    %4 = vector.shape_cast %1 : vector<16x16xf32> to vector<1x16x16xf32>
    tpu.vector_store %arg2[%c0_2, %c0_3, %c0_4], %4 {strides = array<i32>} : memref<2x32x32xf32, #tpu.memory_space<vmem>>, vector<1x16x16xf32>,
    %c1 = arith.constant 1 : index
    %c0_5 = arith.constant 0 : index
    %c0_6 = arith.constant 0 : index
    %5 = vector.load %arg1[%c1, %c0_5, %c0_6] : memref<8x16x16xf32, #tpu.memory_space<vmem>>, vector<1x16x16xf32>
    %6 = vector.shape_cast %5 : vector<1x16x16xf32> to vector<16x16xf32>
    %c0_7 = arith.constant 0 : index
    %c0_8 = arith.constant 0 : index
    %c16 = arith.constant 16 : index
    %7 = vector.load %arg2[%c0_7, %c0_8, %c16] : memref<2x32x32xf32, #tpu.memory_space<vmem>>, vector<1x16x16xf32>
    %8 = vector.shape_cast %7 : vector<1x16x16xf32> to vector<16x16xf32>
    %9 = vector.shape_cast %6 : vector<16x16xf32> to vector<1x16x16xf32>
    tpu.vector_store %arg2[%c0_7, %c0_8, %c16], %9 {strides = array<i32>} : memref<2x32x32xf32, #tpu.memory_space<vmem>>, vector<1x16x16xf32>,
    %c2 = arith.constant 2 : index
    %c0_9 = arith.constant 0 : index
    %c0_10 = arith.constant 0 : index
    %10 = vector.load %arg1[%c2, %c0_9, %c0_10] : memref<8x16x16xf32, #tpu.memory_space<vmem>>, vector<1x16x16xf32>
    %11 = vector.shape_cast %10 : vector<1x16x16xf32> to vector<16x16xf32>
    %c0_11 = arith.constant 0 : index
    %c16_12 = arith.constant 16 : index
    %c0_13 = arith.constant 0 : index
    %12 = vector.load %arg2[%c0_11, %c16_12, %c0_13] : memref<2x32x32xf32, #tpu.memory_space<vmem>>, vector<1x16x16xf32>
    %13 = vector.shape_cast %12 : vector<1x16x16xf32> to vector<16x16xf32>
    %14 = vector.shape_cast %11 : vector<16x16xf32> to vector<1x16x16xf32>
    tpu.vector_store %arg2[%c0_11, %c16_12, %c0_13], %14 {strides = array<i32>} : memref<2x32x32xf32, #tpu.memory_space<vmem>>, vector<1x16x16xf32>,
    %c3 = arith.constant 3 : index
    %c0_14 = arith.constant 0 : index
    %c0_15 = arith.constant 0 : index
    %15 = vector.load %arg1[%c3, %c0_14, %c0_15] : memref<8x16x16xf32, #tpu.memory_space<vmem>>, vector<1x16x16xf32>
    %16 = vector.shape_cast %15 : vector<1x16x16xf32> to vector<16x16xf32>
    %c0_16 = arith.constant 0 : index
    %c16_17 = arith.constant 16 : index
    %c16_18 = arith.constant 16 : index
    %17 = vector.load %arg2[%c0_16, %c16_17, %c16_18] : memref<2x32x32xf32, #tpu.memory_space<vmem>>, vector<1x16x16xf32>
    %18 = vector.shape_cast %17 : vector<1x16x16xf32> to vector<16x16xf32>
    %19 = vector.shape_cast %16 : vector<16x16xf32> to vector<1x16x16xf32>
    tpu.vector_store %arg2[%c0_16, %c16_17, %c16_18], %19 {strides = array<i32>} : memref<2x32x32xf32, #tpu.memory_space<vmem>>, vector<1x16x16xf32>,
    %c4 = arith.constant 4 : index
    %c0_19 = arith.constant 0 : index
    %c0_20 = arith.constant 0 : index
    %20 = vector.load %arg1[%c4, %c0_19, %c0_20] : memref<8x16x16xf32, #tpu.memory_space<vmem>>, vector<1x16x16xf32>
    %21 = vector.shape_cast %20 : vector<1x16x16xf32> to vector<16x16xf32>
    %c1_21 = arith.constant 1 : index
    %c0_22 = arith.constant 0 : index
    %c0_23 = arith.constant 0 : index
    %22 = vector.load %arg2[%c1_21, %c0_22, %c0_23] : memref<2x32x32xf32, #tpu.memory_space<vmem>>, vector<1x16x16xf32>
    %23 = vector.shape_cast %22 : vector<1x16x16xf32> to vector<16x16xf32>
    %24 = vector.shape_cast %21 : vector<16x16xf32> to vector<1x16x16xf32>
    tpu.vector_store %arg2[%c1_21, %c0_22, %c0_23], %24 {strides = array<i32>} : memref<2x32x32xf32, #tpu.memory_space<vmem>>, vector<1x16x16xf32>,
    %c5 = arith.constant 5 : index
    %c0_24 = arith.constant 0 : index
    %c0_25 = arith.constant 0 : index
    %25 = vector.load %arg1[%c5, %c0_24, %c0_25] : memref<8x16x16xf32, #tpu.memory_space<vmem>>, vector<1x16x16xf32>
    %26 = vector.shape_cast %25 : vector<1x16x16xf32> to vector<16x16xf32>
    %c1_26 = arith.constant 1 : index
    %c0_27 = arith.constant 0 : index
    %c16_28 = arith.constant 16 : index
    %27 = vector.load %arg2[%c1_26, %c0_27, %c16_28] : memref<2x32x32xf32, #tpu.memory_space<vmem>>, vector<1x16x16xf32>
    %28 = vector.shape_cast %27 : vector<1x16x16xf32> to vector<16x16xf32>
    %29 = vector.shape_cast %26 : vector<16x16xf32> to vector<1x16x16xf32>
    tpu.vector_store %arg2[%c1_26, %c0_27, %c16_28], %29 {strides = array<i32>} : memref<2x32x32xf32, #tpu.memory_space<vmem>>, vector<1x16x16xf32>,
    %c6 = arith.constant 6 : index
    %c0_29 = arith.constant 0 : index
    %c0_30 = arith.constant 0 : index
    %30 = vector.load %arg1[%c6, %c0_29, %c0_30] : memref<8x16x16xf32, #tpu.memory_space<vmem>>, vector<1x16x16xf32>
    %31 = vector.shape_cast %30 : vector<1x16x16xf32> to vector<16x16xf32>
    %c1_31 = arith.constant 1 : index
    %c16_32 = arith.constant 16 : index
    %c0_33 = arith.constant 0 : index
    %32 = vector.load %arg2[%c1_31, %c16_32, %c0_33] : memref<2x32x32xf32, #tpu.memory_space<vmem>>, vector<1x16x16xf32>
    %33 = vector.shape_cast %32 : vector<1x16x16xf32> to vector<16x16xf32>
    %34 = vector.shape_cast %31 : vector<16x16xf32> to vector<1x16x16xf32>
    tpu.vector_store %arg2[%c1_31, %c16_32, %c0_33], %34 {strides = array<i32>} : memref<2x32x32xf32, #tpu.memory_space<vmem>>, vector<1x16x16xf32>,
    %c7 = arith.constant 7 : index
    %c0_34 = arith.constant 0 : index
    %c0_35 = arith.constant 0 : index
    %35 = vector.load %arg1[%c7, %c0_34, %c0_35] : memref<8x16x16xf32, #tpu.memory_space<vmem>>, vector<1x16x16xf32>
    %36 = vector.shape_cast %35 : vector<1x16x16xf32> to vector<16x16xf32>
    %c1_36 = arith.constant 1 : index
    %c16_37 = arith.constant 16 : index
    %c16_38 = arith.constant 16 : index
    %37 = vector.load %arg2[%c1_36, %c16_37, %c16_38] : memref<2x32x32xf32, #tpu.memory_space<vmem>>, vector<1x16x16xf32>
    %38 = vector.shape_cast %37 : vector<1x16x16xf32> to vector<16x16xf32>
    %39 = vector.shape_cast %36 : vector<16x16xf32> to vector<1x16x16xf32>
    tpu.vector_store %arg2[%c1_36, %c16_37, %c16_38], %39 {strides = array<i32>} : memref<2x32x32xf32, #tpu.memory_space<vmem>>, vector<1x16x16xf32>,
    return
  }
  func.func @transform_0(%arg0: i32) -> (i32, i32, i32) {
    %c0_i32 = arith.constant 0 : i32
    %c0_i32_0 = arith.constant 0 : i32
    %c0_i32_1 = arith.constant 0 : i32
    return %arg0, %c0_i32, %c0_i32_0 : i32, i32, i32
  }
  func.func @transform_1(%arg0: i32) -> (i32, i32, i32) {
    %c0_i32 = arith.constant 0 : i32
    %c0_i32_0 = arith.constant 0 : i32
    %c0_i32_1 = arith.constant 0 : i32
    return %arg0, %c0_i32, %c0_i32_0 : i32, i32, i32
  }
}

</mosaic_0001>

<bundles_post_ra>
// kernel: tpu_custom_call.1
= control target key start
LH: loop header
LB: loop body
LE: loop exit
PB: predicated region body
PF: predicated region fallthrough
CT: control target
= control target key end

     0   :  { %6 = vsyncpa [#allocation3], 0  ;;  %s228_s0 = inlined_call_operand.hbm [shape: f32[8,16,16], index: 0, kind: input, shape index: {}]   ;;  %s229_s1 = inlined_call_operand.hbm [shape: f32[2,32,32], index: 1, kind: output, shape index: {}]  }
   0x1   :  { %7 = vsyncpa [#allocation4], 0  ;;  %s167_s6 = smov [#allocation2]   ;;  %s119_s10 = scalar_lea.hbm %s228_s0, 2048 }
   0x2   :  { %s13_s7 = sshll.u32 %s167_s6, 4  ;;  %p120_p0 = scmp.ne.s32.totalorder %s228_s0, %s119_s10  ;;  %s14_s7 = int_to_ptr.vmem [resolvable:$true] %s13_s7 }
   0x3   :  { %p123_p1 = scmp.lt.u32.totalorder %s119_s10, %s228_s0 }
   0x5   :  { %p125_p2 = pnand %p123_p1, %p120_p0 }
   0x7   :  { %128 = shalt.err (!%p125_p2)
}
   0x8   :  { %s129_s15 = scalar_lea.vmem %s14_s7, 2048  ;;  %p134_p4 = scmp.lt.s32.totalorder %s14_s7, %s14_s7 }
   0x9   :  { %p130_p3 = scmp.ne.s32.totalorder %s14_s7, %s129_s15  ;;  %p135_p5 = scmp.lt.s32.totalorder %s129_s15, %s129_s15 }
   0xb   :  { %p136_p6 = por %p135_p5, %p134_p4 }
   0xd   :  { %p137_p7 = pnand %p136_p6, %p130_p3 }
   0xf   :  { %140 = shalt.err (!%p137_p7)
}
  0x10   :  { %s168_s16 = smov 128   ;;  %s169_s17 = smov 8  }
  0x11   :  { %19 = dma.hbm_to_vmem [thread:$0]  %s228_s0, 2048, %s14_s7, [#allocation3], %s168_s16, %s168_s16, %s169_s17  }
  0x12   :  { %163 = dma.done.wait [#allocation3], 2048  }
  0x13   :  { %164 = vsyncadd [#allocation3], 4294965248  ;;  %v48_v0 = vld [vmem:[#allocation2 + $0x30] sm:$0xff]  ;;  %vm25_vm0 = vcmask 130048   ;;  %s170_s20 = smov 16   ;;  %v49_v2 = vld [vmem:[#allocation2 + $0x38] sm:$0xff] }
  0x14   :  { %v29_v1 = vld [vmem:[#allocation2 + $0x10] sm:$0xff]  ;;  %52 = vrot.lane.b32.xlu1 %v48_v0, %s170_s20  ;;  %v30_v3 = vld [vmem:[#allocation2 + $0x18] sm:$0xff]  ;;  %v43_v4 = vld [vmem:[#allocation2 + $0x20] sm:$0xff]  ;;  %vm39_vm1 = vcmask 261248   ;;  %s171_s0 = smov [#allocation5]  }
  0x15   :  { %33 = vrot.lane.b32.xlu0 %v29_v1, %s170_s20  ;;  %45 = vst.msk [vmem:[#allocation5 + $0x10] sm:$0xff] %vm25_vm0, %v43_v4  ;;  %v23_v5 = vld [vmem:[#allocation2] sm:$0xff]  ;;  %v44_v6 = vld [vmem:[#allocation2 + $0x28] sm:$0xff]  ;;  %v68_v12 = vld [vmem:[#allocation2 + $0x58] sm:$0xff]  ;;  %s102_s21 = sshll.u32 %s171_s0, 4  ;;  %s103_s21 = int_to_ptr.vmem [resolvable:$true] %s102_s21 }
  0x16   :  { %v24_v7 = vld [vmem:[#allocation2 + $0x8] sm:$0xff]  ;;  %26 = vst.msk [vmem:[#allocation5] sm:$0xff] %vm25_vm0, %v23_v5  ;;  %46 = vst.msk [vmem:[#allocation5 + $0x18] sm:$0xff] %vm25_vm0, %v44_v6  ;;  %v61_v9 = vld [vmem:[#allocation2 + $0x40] sm:$0xff]  ;;  %s141_s22 = scalar_lea.vmem %s103_s21, 1024  ;;  %p146_p9 = scmp.lt.s32.totalorder %s103_s21, %s103_s21 }
  0x17   :  { %27 = vst.msk [vmem:[#allocation5 + $0x8] sm:$0xff] %vm25_vm0, %v24_v7  ;;  %v62_v8 = vld [vmem:[#allocation2 + $0x48] sm:$0xff]  ;;  %64 = vst.msk [vmem:[#allocation5 + $0x20] sm:$0xff] %vm25_vm0, %v61_v9  ;;  %v80_v11 = vld [vmem:[#allocation2 + $0x60] sm:$0xff]  ;;  %p142_p8 = scmp.ne.s32.totalorder %s103_s21, %s141_s22  ;;  %p147_p10 = scmp.lt.s32.totalorder %s141_s22, %s141_s22 }
  0x18   :  { %v81_v10 = vld [vmem:[#allocation2 + $0x68] sm:$0xff]  ;;  %54 = vrot.lane.b32.xlu1 %v49_v2, %s170_s20  ;;  %65 = vst.msk [vmem:[#allocation5 + $0x28] sm:$0xff] %vm25_vm0, %v62_v8  ;;  %v67_v13 = vld [vmem:[#allocation2 + $0x50] sm:$0xff]  ;;  %82 = vst.msk [vmem:[#allocation5 + $0x30] sm:$0xff] %vm25_vm0, %v80_v11 }
  0x19   :  { %35 = vrot.lane.b32.xlu0 %v30_v3, %s170_s20  ;;  %83 = vst.msk [vmem:[#allocation5 + $0x38] sm:$0xff] %vm25_vm0, %v81_v10  ;;  %v86_v14 = vld [vmem:[#allocation2 + $0x78] sm:$0xff]  ;;  %v85_v15 = vld [vmem:[#allocation2 + $0x70] sm:$0xff]  ;;  %p148_p11 = por %p147_p10, %p146_p9 }
  0x1b   :  { %p149_p12 = pnand %p148_p11, %p142_p8 }
  0x1c   :  { %73 = vrot.lane.b32.xlu1 %v68_v12, %s170_s20 }
  0x1d   :  { %71 = vrot.lane.b32.xlu0 %v67_v13, %s170_s20 }
  0x20   :  { %91 = vrot.lane.b32.xlu1 %v86_v14, %s170_s20 }
  0x21   :  { %89 = vrot.lane.b32.xlu0 %v85_v15, %s170_s20 }
  0x86   :  { %v53_v16 = vpop.permute.xlu1 %52 }
  0x87   :  { %v34_v17 = vpop.permute.xlu0 %33  ;;  %58 = vst.msk [vmem:[#allocation5 + $0x10] sm:$0xff] %vm39_vm1, %v53_v16 }
  0x88   :  { %40 = vst.msk [vmem:[#allocation5] sm:$0xff] %vm39_vm1, %v34_v17 }
  0x8a   :  { %v55_v18 = vpop.permute.xlu1 %54 }
  0x8b   :  { %v36_v19 = vpop.permute.xlu0 %35  ;;  %59 = vst.msk [vmem:[#allocation5 + $0x18] sm:$0xff] %vm39_vm1, %v55_v18 }
  0x8c   :  { %41 = vst.msk [vmem:[#allocation5 + $0x8] sm:$0xff] %vm39_vm1, %v36_v19 }
  0x8e   :  { %v74_v20 = vpop.permute.xlu1 %73 }
  0x8f   :  { %v72_v21 = vpop.permute.xlu0 %71  ;;  %78 = vst.msk [vmem:[#allocation5 + $0x28] sm:$0xff] %vm39_vm1, %v74_v20 }
  0x90   :  { %77 = vst.msk [vmem:[#allocation5 + $0x20] sm:$0xff] %vm39_vm1, %v72_v21 }
  0x92   :  { %v92_v22 = vpop.permute.xlu1 %91 }
  0x93   :  { %v90_v23 = vpop.permute.xlu0 %89  ;;  %96 = vst.msk [vmem:[#allocation5 + $0x38] sm:$0xff] %vm39_vm1, %v92_v22 }
  0x94   :  { %95 = vst.msk [vmem:[#allocation5 + $0x30] sm:$0xff] %vm39_vm1, %v90_v23 }
  0x95   :  { %152 = shalt.err (!%p149_p12)
}
  0x96   :  { %s153_s25 = scalar_lea.hbm %s229_s1, 1024 }
  0x97   :  { %p154_p13 = scmp.ne.s32.totalorder %s229_s1, %s153_s25  ;;  %p157_p0 = scmp.lt.u32.totalorder %s153_s25, %s229_s1 }
  0x99   :  { %p159_p1 = pnand %p157_p0, %p154_p13 }
  0x9b   :  { %162 = shalt.err (!%p159_p1)
}
  0x9c   :  { %108 = dma.vmem_to_hbm [thread:$0]  %s103_s21, 1024, %s229_s1, [#allocation4], %s168_s16, %s168_s16, %s169_s17  }
  0x9d   :  { %165 = dma.done.wait [#allocation4], 1024  }
  0x9e   :  { %166 = vsyncadd [#allocation4], 4294966272 }
  0x9f   :  { %112 = vsyncpa [#allocation3], 1 }
  0xa0   :  { %113 = vsyncpa [#allocation4], 1 }

</bundles_post_ra>
